<compile_context>
chip_gen: v7x
topology: tpu7x:2x2x1
jax: 0.10.0
libtpu: 0.0.40
codegen_flags: <defaults>
</compile_context>

<pallas_src>
import functools
import math

import jax
import jax.numpy as jnp
from jax import lax
from jax.experimental import pallas as pl
from jax.experimental.pallas import tpu as pltpu

_VMEM_LIMIT = 48 * 1024 * 1024


def _pick_tile(n, max_tile):
    """Largest multiple-of-8 tile dividing n; prefer >= 2 grid steps (v7x has 2 TCs)."""
    cands = [t for t in (1024, 512, 256, 128, 64, 32, 16, 8) if t <= max_tile]
    for t in cands:
        if t <= n and n % t == 0 and n // t >= 2:
            return t
    for t in cands:
        if t <= n and n % t == 0:
            return t
    return n  # small / odd extents: single full-extent block


# ---------------------------------------------------------------------------
# Kernel 1: fused QKV projection. One (tm, H) x (H, 3H) matmul per row tile.
# ---------------------------------------------------------------------------
def _qkv_proj_kernel(x_ref, w_ref, b_ref, q_ref, k_ref, v_ref, *, hidden):
    acc = jnp.dot(x_ref[...], w_ref[...], preferred_element_type=jnp.float32)
    acc = acc + b_ref[...].astype(jnp.float32)
    q_ref[...] = acc[:, :hidden].astype(q_ref.dtype)
    k_ref[...] = acc[:, hidden:2 * hidden].astype(k_ref.dtype)
    v_ref[...] = acc[:, 2 * hidden:].astype(v_ref.dtype)


# ---------------------------------------------------------------------------
# Kernel 2: attention. One (batch, query-tile) per grid step; q/k/v/ctx stay in
# the flat (B*S, H) layout, heads live along the lane axis and are unrolled.
# ---------------------------------------------------------------------------
def _attention_kernel(q_ref, k_ref, v_ref, mask_ref, o_ref, *, num_heads, head_dim, scale):
    q_all = q_ref[...] * scale                       # fold 1/sqrt(d) into q (O(tq*H))
    k_all = k_ref[...]
    v_all = v_ref[...]
    m = mask_ref[...].astype(jnp.float32)             # (1, S) or (tq, S) additive mask

    for h in range(num_heads):                         # static unroll over heads
        sl = slice(h * head_dim, (h + 1) * head_dim)
        q = q_all[:, sl]                               # (tq, d)
        k = k_all[:, sl]                               # (S,  d)
        v = v_all[:, sl]                               # (S,  d)
        # q @ k^T without materializing the transpose: contract last dims of both.
        s = lax.dot_general(q, k, (((1,), (1,)), ((), ())),
                            preferred_element_type=jnp.float32) + m       # (tq, S)
        s_max = jnp.max(s, axis=-1, keepdims=True)
        p = jnp.exp(s - s_max)
        denom = jnp.sum(p, axis=-1, keepdims=True)
        # TODO(synk): attention_probs dropout omitted (inference / p = 0).
        ctx = jnp.dot(p.astype(v.dtype), v, preferred_element_type=jnp.float32)  # (tq, d)
        # Defer 1/denom to the small (tq, d) context; EUP approx reciprocal is ~free.
        # NOTE: fully -inf-masked rows would give denom == 0 -> NaN; BERT's -1e4 never does.
        ctx = ctx * pl.reciprocal(denom, approx=True)
        o_ref[:, sl] = ctx.astype(o_ref.dtype)


# ---------------------------------------------------------------------------
# Kernel 3: output dense + residual add + LayerNorm over row tiles.
# ---------------------------------------------------------------------------
def _self_output_kernel(ctx_ref, res_ref, w_ref, b_ref, g_ref, beta_ref, o_ref, *, eps):
    y = jnp.dot(ctx_ref[...], w_ref[...], preferred_element_type=jnp.float32)
    # TODO(synk): hidden_states dropout omitted (inference / p = 0).
    y = y + b_ref[...].astype(jnp.float32) + res_ref[...].astype(jnp.float32)
    mu = jnp.mean(y, axis=-1, keepdims=True)
    var = jnp.mean(jnp.square(y - mu), axis=-1, keepdims=True)
    y = (y - mu) * jax.lax.rsqrt(var + eps)
    y = y * g_ref[...].astype(jnp.float32) + beta_ref[...].astype(jnp.float32)
    o_ref[...] = y.astype(o_ref.dtype)


# ---------------------------------------------------------------------------
# Wrapper: full BertAttention forward.
# ---------------------------------------------------------------------------
def bert_attention(hidden_states, attention_mask, params, *, num_heads,
                   layer_norm_eps=1e-12, row_tile=None, q_tile=None,
                   intermediate_dtype=None):
    """hidden_states: (B, S, H); attention_mask: additive, broadcastable to (B,1,{1,S},S) or None."""
    B, S, H = hidden_states.shape
    assert H % num_heads == 0
    d = H // num_heads
    rows = B * S
    dtype = hidden_states.dtype
    # Intermediates (q/k/v/ctx) can be emitted in bf16 to halve inter-kernel HBM traffic.
    idtype = dtype if intermediate_dtype is None else intermediate_dtype

    tm = _pick_tile(rows, 512) if row_tile is None else row_tile
    assert rows % tm == 0
    tq = _pick_tile(S, 256) if q_tile is None else q_tile
    assert S % tq == 0
    n_q_tiles = S // tq

    x2d = hidden_states.reshape(rows, H)

    # Fused QKV weight/bias -> one MXU matmul, one weight DMA stream.
    w_qkv = jnp.concatenate([params["wq"], params["wk"], params["wv"]], axis=1)
    b_qkv = jnp.concatenate([params["bq"], params["bk"], params["bv"]]).reshape(1, 3 * H)

    row_spec = pl.BlockSpec((tm, H), lambda i: (i, 0))
    vec_spec = pl.BlockSpec((1, H), lambda i: (0, 0))
    cparams_1d = pltpu.CompilerParams(dimension_semantics=("parallel",),
                                      vmem_limit_bytes=_VMEM_LIMIT)

    # ---- 1) fused QKV projection -------------------------------------------------------
    q2d, k2d, v2d = pl.pallas_call(
        functools.partial(_qkv_proj_kernel, hidden=H),
        out_shape=[jax.ShapeDtypeStruct((rows, H), idtype)] * 3,
        grid_spec=pltpu.PrefetchScalarGridSpec(
            num_scalar_prefetch=0,
            grid=(rows // tm,),
            in_specs=[row_spec,
                      pl.BlockSpec((H, 3 * H), lambda i: (0, 0)),
                      pl.BlockSpec((1, 3 * H), lambda i: (0, 0))],
            out_specs=[row_spec, row_spec, row_spec]),
        compiler_params=cparams_1d,
    )(x2d, w_qkv, b_qkv)

    # ---- 2) attention: grid over (batch, query tile), flat layout in and out ------------
    if attention_mask is None:
        mask3 = jnp.zeros((B, 1, S), jnp.float32)          # tiny; single kernel variant
    else:
        m = jnp.asarray(attention_mask, jnp.float32)
        while m.ndim < 4:
            m = m[None]
        mq = m.shape[-2]
        assert mq in (1, S), f"mask query dim must be 1 or {S}"
        # TODO(synk): per-head masks (head dim != 1) are not supported by this layout.
        mask3 = jnp.broadcast_to(m, (B, 1, mq, S)).reshape(B, mq, S)
    mrows = mask3.shape[1]

    sq = pl.Squeezed()
    q_spec = pl.BlockSpec((tq, H), lambda b, qi: (b * n_q_tiles + qi, 0))
    kv_spec = pl.BlockSpec((S, H), lambda b, qi: (b, 0))
    if mrows == 1:
        mask_spec = pl.BlockSpec((sq, 1, S), lambda b, qi: (b, 0, 0))
    else:
        mask_spec = pl.BlockSpec((sq, tq, S), lambda b, qi: (b, qi, 0))

    ctx2d = pl.pallas_call(
        functools.partial(_attention_kernel, num_heads=num_heads, head_dim=d,
                          scale=1.0 / math.sqrt(d)),
        out_shape=jax.ShapeDtypeStruct((rows, H), idtype),
        grid_spec=pltpu.PrefetchScalarGridSpec(
            num_scalar_prefetch=0,
            grid=(B, n_q_tiles),
            in_specs=[q_spec, kv_spec, kv_spec, mask_spec],
            out_specs=q_spec),
        compiler_params=pltpu.CompilerParams(
            dimension_semantics=("parallel", "parallel"),
            vmem_limit_bytes=_VMEM_LIMIT),
    )(q2d, k2d, v2d, mask3)

    # ---- 3) output projection + residual + LayerNorm ------------------------------------
    out2d = pl.pallas_call(
        functools.partial(_self_output_kernel, eps=layer_norm_eps),
        out_shape=jax.ShapeDtypeStruct((rows, H), dtype),
        grid_spec=pltpu.PrefetchScalarGridSpec(
            num_scalar_prefetch=0,
            grid=(rows // tm,),
            in_specs=[row_spec, row_spec,
                      pl.BlockSpec((H, H), lambda i: (0, 0)),
                      vec_spec, vec_spec, vec_spec],
            out_specs=row_spec),
        compiler_params=cparams_1d,
    )(ctx2d, x2d, params["wo"], params["bo"].reshape(1, H),
      params["ln_gamma"].reshape(1, H), params["ln_beta"].reshape(1, H))

    # TODO(synk): layer_state KV-cache concatenation (stateful Python dict) not implemented.
    return out2d.reshape(B, S, H)


# ---------------------------------------------------------------------------
# Pure-JAX reference mirroring the PyTorch module (eval mode).
# ---------------------------------------------------------------------------
def _bert_attention_ref(x, mask, params, *, num_heads, eps=1e-12):
    B, S, H = x.shape
    d = H // num_heads
    q = x @ params["wq"] + params["bq"]
    k = x @ params["wk"] + params["bk"]
    v = x @ params["wv"] + params["bv"]

    def heads(t):
        return t.reshape(B, S, num_heads, d).transpose(0, 2, 1, 3)

    q, k, v = heads(q), heads(k), heads(v)
    s = jnp.einsum("bhqd,bhkd->bhqk", q, k) / math.sqrt(d)
    if mask is not None:
        s = s + mask
    p = jax.nn.softmax(s, axis=-1)
    ctx = jnp.einsum("bhqk,bhkd->bhqd", p, v)
    ctx = ctx.transpose(0, 2, 1, 3).reshape(B, S, H)
    y = ctx @ params["wo"] + params["bo"] + x
    mu = y.mean(-1, keepdims=True)
    var = ((y - mu) ** 2).mean(-1, keepdims=True)
    y = (y - mu) / jnp.sqrt(var + eps)
    return y * params["ln_gamma"] + params["ln_beta"]


if __name__ == "__main__":
    key = jax.random.PRNGKey(0)
    ks = jax.random.split(key, 12)

    B, S, H, NH = 2, 8, 32, 4
    x = jax.random.normal(ks[0], (B, S, H), jnp.float32)

    wscale = 1.0 / math.sqrt(H)
    params = {
        "wq": jax.random.normal(ks[1], (H, H), jnp.float32) * wscale,
        "bq": jax.random.normal(ks[2], (H,), jnp.float32) * 0.02,
        "wk": jax.random.normal(ks[3], (H, H), jnp.float32) * wscale,
        "bk": jax.random.normal(ks[4], (H,), jnp.float32) * 0.02,
        "wv": jax.random.normal(ks[5], (H, H), jnp.float32) * wscale,
        "bv": jax.random.normal(ks[6], (H,), jnp.float32) * 0.02,
        "wo": jax.random.normal(ks[7], (H, H), jnp.float32) * wscale,
        "bo": jax.random.normal(ks[8], (H,), jnp.float32) * 0.02,
        "ln_gamma": 1.0 + 0.1 * jax.random.normal(ks[9], (H,), jnp.float32),
        "ln_beta": 0.1 * jax.random.normal(ks[10], (H,), jnp.float32),
    }

    # BERT-style additive attention mask (B, 1, 1, S): mask the last 2 keys of batch 1.
    mask = jnp.zeros((B, 1, 1, S), jnp.float32)
    mask = mask.at[1, 0, 0, S - 2:].set(-1e4)

    out = bert_attention(x, mask, params, num_heads=NH)
    out = jax.block_until_ready(out)

    ref = jax.block_until_ready(_bert_attention_ref(x, mask, params, num_heads=NH))
    err = float(jnp.max(jnp.abs(out - ref)))
    assert err < 2e-2, f"max abs err {err}"

    print("KERNEL_OK")
</pallas_src>

<mosaic_0001>
module attributes {stable_mosaic.version = 11 : i64} {
  func.func @_qkv_proj_kernel(%arg0: i32, %arg1: memref<8x32xf32, #tpu.memory_space<vmem>>, %arg2: memref<32x96xf32, #tpu.memory_space<vmem>>, %arg3: memref<1x96xf32, #tpu.memory_space<vmem>>, %arg4: memref<8x32xf32, #tpu.memory_space<vmem>>, %arg5: memref<8x32xf32, #tpu.memory_space<vmem>>, %arg6: memref<8x32xf32, #tpu.memory_space<vmem>>) attributes {dimension_semantics = [#tpu.dimension_semantics<parallel>], iteration_bounds = array<i64: 2>, scalar_prefetch = 0 : i64, scratch_operands = 0 : i64, tpu.core_type = #tpu.core_type<tc>, window_params = [{transform_indices = @transform_0, window_bounds = array<i64: 8, 32>}, {pipeline_mode = #tpu.pipeline_mode<synchronous>, transform_indices = @transform_1, window_bounds = array<i64: 32, 96>}, {pipeline_mode = #tpu.pipeline_mode<synchronous>, transform_indices = @transform_2, window_bounds = array<i64: 1, 96>}, {transform_indices = @transform_3, window_bounds = array<i64: 8, 32>}, {transform_indices = @transform_4, window_bounds = array<i64: 8, 32>}, {transform_indices = @transform_5, window_bounds = array<i64: 8, 32>}]} {
    %c0 = arith.constant 0 : index
    %c0_0 = arith.constant 0 : index
    %0 = vector.load %arg1[%c0, %c0_0] : memref<8x32xf32, #tpu.memory_space<vmem>>, vector<8x32xf32>
    %c0_1 = arith.constant 0 : index
    %c0_2 = arith.constant 0 : index
    %1 = vector.load %arg2[%c0_1, %c0_2] : memref<32x96xf32, #tpu.memory_space<vmem>>, vector<32x96xf32>
    %cst = arith.constant dense<0.000000e+00> : vector<8x96xf32>
    %2 = tpu.matmul %0, %1, %cst {dimension_numbers = #tpu.dot_dimension_numbers<[1], [0], [0], [1], [0, 0, 1, 1], [], []>} : vector<8x32xf32>, vector<32x96xf32>, vector<8x96xf32> -> vector<8x96xf32>
    %c0_3 = arith.constant 0 : index
    %c0_4 = arith.constant 0 : index
    %3 = vector.load %arg3[%c0_3, %c0_4] : memref<1x96xf32, #tpu.memory_space<vmem>>, vector<1x96xf32>
    %4 = vector.broadcast %3 : vector<1x96xf32> to vector<8x96xf32>
    %5 = arith.addf %2, %4 : vector<8x96xf32>
    %6 = vector.extract_strided_slice %5 {offsets = [0, 0], sizes = [8, 32], strides = [1, 1]} : vector<8x96xf32> to vector<8x32xf32>
    %c0_5 = arith.constant 0 : index
    %c0_6 = arith.constant 0 : index
    %7 = vector.load %arg4[%c0_5, %c0_6] : memref<8x32xf32, #tpu.memory_space<vmem>>, vector<8x32xf32>
    tpu.vector_store %arg4[%c0_5, %c0_6], %6 {strides = array<i32>} : memref<8x32xf32, #tpu.memory_space<vmem>>, vector<8x32xf32>,
    %8 = vector.extract_strided_slice %5 {offsets = [0, 32], sizes = [8, 32], strides = [1, 1]} : vector<8x96xf32> to vector<8x32xf32>
    %c0_7 = arith.constant 0 : index
    %c0_8 = arith.constant 0 : index
    %9 = vector.load %arg5[%c0_7, %c0_8] : memref<8x32xf32, #tpu.memory_space<vmem>>, vector<8x32xf32>
    tpu.vector_store %arg5[%c0_7, %c0_8], %8 {strides = array<i32>} : memref<8x32xf32, #tpu.memory_space<vmem>>, vector<8x32xf32>,
    %10 = vector.extract_strided_slice %5 {offsets = [0, 64], sizes = [8, 32], strides = [1, 1]} : vector<8x96xf32> to vector<8x32xf32>
    %c0_9 = arith.constant 0 : index
    %c0_10 = arith.constant 0 : index
    %11 = vector.load %arg6[%c0_9, %c0_10] : memref<8x32xf32, #tpu.memory_space<vmem>>, vector<8x32xf32>
    tpu.vector_store %arg6[%c0_9, %c0_10], %10 {strides = array<i32>} : memref<8x32xf32, #tpu.memory_space<vmem>>, vector<8x32xf32>,
    return
  }
  func.func @transform_0(%arg0: i32) -> (i32, i32) {
    %c0_i32 = arith.constant 0 : i32
    %c0_i32_0 = arith.constant 0 : i32
    return %arg0, %c0_i32 : i32, i32
  }
  func.func @transform_1(%arg0: i32) -> (i32, i32) {
    %c0_i32 = arith.constant 0 : i32
    %c0_i32_0 = arith.constant 0 : i32
    %c0_i32_1 = arith.constant 0 : i32
    return %c0_i32, %c0_i32_0 : i32, i32
  }
  func.func @transform_2(%arg0: i32) -> (i32, i32) {
    %c0_i32 = arith.constant 0 : i32
    %c0_i32_0 = arith.constant 0 : i32
    %c0_i32_1 = arith.constant 0 : i32
    return %c0_i32, %c0_i32_0 : i32, i32
  }
  func.func @transform_3(%arg0: i32) -> (i32, i32) {
    %c0_i32 = arith.constant 0 : i32
    %c0_i32_0 = arith.constant 0 : i32
    return %arg0, %c0_i32 : i32, i32
  }
  func.func @transform_4(%arg0: i32) -> (i32, i32) {
    %c0_i32 = arith.constant 0 : i32
    %c0_i32_0 = arith.constant 0 : i32
    return %arg0, %c0_i32 : i32, i32
  }
  func.func @transform_5(%arg0: i32) -> (i32, i32) {
    %c0_i32 = arith.constant 0 : i32
    %c0_i32_0 = arith.constant 0 : i32
    return %arg0, %c0_i32 : i32, i32
  }
}

</mosaic_0001>

<bundles_post_ra>
// kernel: tpu_custom_call.1
= control target key start
LH: loop header
LB: loop body
LE: loop exit
PB: predicated region body
PF: predicated region fallthrough
CT: control target
= control target key end

     0   :  { %11 = vsyncpa [#allocation3], 0  ;;  %s1196_s0 = inlined_call_operand.hbm [shape: f32[16,32], index: 0, kind: input, shape index: {}]   ;;  %s1197_s1 = inlined_call_operand.hbm [shape: f32[32,96], index: 1, kind: input, shape index: {}]   ;;  %s1198_s2 = inlined_call_operand.vmem [shape: f32[1,96], index: 2, kind: input, shape index: {}]   ;;  %s1199_s3 = inlined_call_operand.hbm [shape: f32[16,32], index: 3, kind: output, shape index: {0}]   ;;  %s1200_s4 = inlined_call_operand.hbm [shape: f32[16,32], index: 4, kind: output, shape index: {1}]   ;;  %s1201_s5 = inlined_call_operand.hbm [shape: f32[16,32], index: 5, kind: output, shape index: {2}]  }
   0x1   :  { %13 = vsyncpa [#allocation3 + $0x1], 0 }
   0x2   :  { %14 = vsyncpa [#allocation6], 0 }
   0x3   :  { %15 = vsyncpa [#allocation4], 0 }
   0x4   :  { %17 = vsyncpa [#allocation4 + $0x1], 0 }
   0x5   :  { %18 = vsyncpa [#allocation9], 0 }
   0x6   :  { %20 = vsyncpa [#allocation9 + $0x1], 0  ;;  %s910_s18 = smov 0   ;;  %s912_s19 = smov 0  }
   0x7   :  { %s914_s20 = smov 0   ;;  %s916_s21 = smov 0  }
   0x8 LB: > { %s931_s22 = sadd.s32 4294967295, %s866_s21   ;;  %s560_s23 = sadd.s32 4294967294, %s866_s21   ;;  %s866_s21 = sphi %s916_s21, %s1221_s21   ;;  %s862_s20 = sphi %s914_s20, %s1220_s20   ;;  %s858_s19 = sphi %s912_s19, %s1219_s19   ;;  %s854_s18 = sphi %s910_s18, %s1218_s18  }
   0x9   : > { %p46_p0 = scmp.ne.s32.totalorder %s858_s19, %s854_s18  ;;  %p1202_p1 = scmp.eq.s32.totalorder %s931_s22, 0 }
   0xa   : > { %p118_p3 = scmp.eq.s32.totalorder %s560_s23, 1  ;;  %p561_p5 = scmp.ge.s32.totalorder %s866_s21, 1 }
   0xb   : > { %p942_p4 = por %p1202_p1, %p46_p0  ;;  %p177_p7 = scmp.lt.s32.totalorder %s866_s21, 3 }
   0xc   : > { %p947_p6 = por %p118_p3, %p46_p0  ;;  %s868_s27 = smov [#allocation5]  }
   0xd   : > { %s1205_s24 = scalar_select %p942_p4, 1, 0 }
   0xe   : > { %s1206_s25 = scalar_select %p947_p6, 1, 0 }
   0xf   : > { %p952_p8 = pnand %p561_p5, %p177_p7  ;;  %s189_s28 = sshll.u32 %s868_s27, 4  ;;  %s956_s28 = int_to_ptr.vmem [resolvable:$true] %s189_s28 }
  0x10   : > { %s968_s30 = sadd.s32 1, %s866_s21   ;;  %s33_s6 = sadd.s32 1, %s862_s20 }
  0x11   : > { %s1207_s26 = scalar_select %p952_p8, 1, 0 }
  0x12   : > { %p616_p9 = pneg %p952_p8  ;;  %s30_s7 = ssub.s32 %s866_s21, %s968_s30 }
  0x13   : > { %s678_s10 = scalar_lea.hbm %s1197_s1, 512 }
  0x14   : > { %p963_p11 = pnand %p616_p9, %p1202_p1  ;;  %p679_p12 = scmp.ne.s32.totalorder %s1197_s1, %s678_s10 }
  0x15   : > { %p685_p5 = scmp.lt.u32.totalorder %s678_s10, %s1197_s1 }
  0x16   : > { %p680_p13 = pneg %p963_p11 }
  0x18   : > { %p681_p0 = pnand %p680_p13, %p679_p12 }
  0x1a   : > { %p682_p3 = pneg %p681_p0 }
  0x1c   : > { %p687_p7 = pnand %p685_p5, %p682_p3 }
  0x1e   : > { %690 = shalt.err (!%p687_p7)
}
  0x1f   : > { %s691_s15 = scalar_lea.vmem %s956_s28, 512  ;;  %p699_p2 = scmp.lt.s32.totalorder %s956_s28, %s956_s28 }
  0x20   : > { %p692_p9 = scmp.ne.s32.totalorder %s956_s28, %s691_s15  ;;  %p700_p6 = scmp.lt.s32.totalorder %s691_s15, %s691_s15 }
  0x22   : > { %p694_p10 = pnand %p692_p9, %p680_p13  ;;  %p701_p4 = por %p700_p6, %p699_p2 }
  0x24   : > { %p695_p1 = pneg %p694_p10 }
  0x26   : > { %p702_p8 = pnand %p701_p4, %p695_p1 }
  0x28   : > { %705 = shalt.err (!%p702_p8)
}
  0x29   : > { %s869_s16 = smov 128   ;;  %s870_s17 = smov 8  }
  0x2a   : > { %619 = dma.hbm_to_vmem [thread:$0]  (!%p963_p11), %s1197_s1, 512, %s956_s28, [#allocation6], %s869_s16, %s869_s16, %s870_s17  }
  0x2b   : > { %p31_p2 = scmp.eq.s32.totalorder %s30_s7, 0  ;;  %p40_p1 = scmp.ne.s32.totalorder %s862_s20, %s858_s19 }
  0x2c   : > { %p41_p4 = scmp.eq.s32.totalorder %s866_s21, 0  ;;  %p635_p6 = scmp.lt.s32.totalorder %s866_s21, 2 }
  0x2d   : > { %s999_s9 = scalar_select %p31_p2, %s862_s20, %s33_s6  }
  0x2e   : > { %p42_p8 = por %p41_p4, %p40_p1  ;;  %p1209_p10 = scmp.eq.s32.totalorder %s931_s22, 1 }
  0x2f   : > { %s206_s11 = sand.u32 1, %s862_s20   ;;  %s565_s12 = sshll.u32 %s866_s21, 7 }
  0x30   : > { %p1003_p12 = por %p1209_p10, %p40_p1  ;;  %s564_s13 = sshll.u32 %s206_s11, 3 }
  0x31   : > { %s1012_s15 = scalar_lea.hbm %s1196_s0, %s565_s12  ;;  %s210_s28 = scalar_lea.vmem [#allocation2], %s564_s13 }
  0x32   : > { %s217_s6 = sshll.u32 %s210_s28, 4  ;;  %p1014_p11 = pnand %p635_p6, %p42_p8  ;;  %s1018_s6 = int_to_ptr.vmem [resolvable:$true] %s217_s6 }
  0x33   : > { %s207_s16 = scalar_lea.sflag [#allocation3], %s206_s11  ;;  %s706_s17 = scalar_lea.hbm %s1012_s15, 128 }
  0x34   : > { %p707_p13 = scmp.ne.s32.totalorder %s1012_s15, %s706_s17  ;;  %p708_p0 = pneg %p1014_p11 }
  0x35   : > { %s711_s12 = scalar_lea.hbm %s1196_s0, 256  ;;  %p712_p7 = scmp.lt.u32.totalorder %s1012_s15, %s1196_s0 }
  0x36   : > { %p709_p3 = pnand %p708_p0, %p707_p13  ;;  %p713_p9 = scmp.lt.u32.totalorder %s711_s12, %s706_s17 }
  0x37   : > { %p715_p1 = scmp.lt.u32.totalorder %s706_s17, %s1012_s15 }
  0x38   : > { %p710_p5 = pneg %p709_p3  ;;  %p714_p2 = por %p713_p9, %p712_p7 }
  0x3a   : > { %p716_p4 = por %p715_p1, %p714_p2 }
  0x3c   : > { %p717_p6 = pnand %p716_p4, %p710_p5 }
  0x3e   : > { %720 = shalt.err (!%p717_p6)
}
  0x3f   : > { %s721_s11 = scalar_lea.vmem %s1018_s6, 128  ;;  %s871_s14 = smov [#allocation2]  }
  0x40   : > { %p722_p8 = scmp.ne.s32.totalorder %s1018_s6, %s721_s11  ;;  %s726_s28 = sshll.u32 %s871_s14, 4  ;;  %s727_s28 = int_to_ptr.vmem [resolvable:$false] %s726_s28 }
  0x41   : > { %s728_s27 = scalar_lea.vmem %s727_s28, 256  ;;  %p729_p3 = scmp.lt.s32.totalorder %s1018_s6, %s727_s28 }
  0x42   : > { %p724_p10 = pnand %p722_p8, %p708_p0  ;;  %p730_p7 = scmp.lt.s32.totalorder %s728_s27, %s721_s11 }
  0x44   : > { %p725_p13 = pneg %p724_p10  ;;  %p731_p9 = por %p730_p7, %p729_p3 }
  0x46   : > { %p732_p2 = pnand %p731_p9, %p725_p13 }
  0x48   : > { %735 = shalt.err (!%p732_p2)
}
  0x49   : > { %623 = dma.hbm_to_vmem [thread:$0]  (!%p1014_p11), %s1012_s15, 128, %s1018_s6, %s207_s16  }
  0x4a   : > { %p1212_p5 = scmp.ne.s32.totalorder %s1207_s26, 0 }
  0x4b   : > { %s1048_s17 = sand.u32 (!%p1212_p5), 1, %s858_s19   ;;  %p1213_p0 = scmp.ne.s32.totalorder (!%p1212_p5), %s1205_s24, 0 }
  0x4c   : > { %226 = sbr.rel (%p1212_p5) target bundleno = 463 (0x1cf), region = 32  ;;  %s1051_s8 = sshll.u32 (!%p1212_p5), %s1048_s17, 3 }
  0x4d   : > { %s229_s12 = scalar_lea.sflag (!%p1212_p5), [#allocation3], %s1048_s17  ;;  %s232_s13 = scalar_lea.vmem (!%p1212_p5), [#allocation2], %s1051_s8 }
  0x53   : > { %837 = dma.done.wait (%p1213_p0), %s229_s12, 128  }
  0x54   : > { %839 = vsyncadd (%p1213_p0), %s229_s12, 4294967168  ;;  %p1214_p11 = scmp.eq.s32.totalorder %s931_s22, 0 }
  0x56   : > { %841 = dma.done.wait (%p1214_p11), [#allocation6], 512   ;;  %p1215_p1 = pmov %p1214_p11 }
  0x57   : > { %v872_v0 = vmov 0.0|0.0   ;;  %vm873_vm0 = vmmov 0   ;;  %v874_v1 = vmov 0.0   ;;  %v274_v2 = vld [vmem:[#allocation5] sm:$0xff]  ;;  %v275_v3 = vld [vmem:[#allocation5 + $0x8] sm:$0xff]  ;;  %v276_v4 = vld [vmem:[#allocation5 + $0x10] sm:$0xff] }
  0x58   : > { %843 = vsyncadd (%p1215_p1), [#allocation6], 4294966784  ;;  %598 = vmatprep.subr.bf16.mxu0 %v872_v0  ;;  %595 = vmatprep.mubr.msk.f32.mxu0 %vm873_vm0, %v874_v1  ;;  %v599_v5 = vpack.c.bf16 %v275_v3, %v274_v2  ;;  %v277_v6 = vld [vmem:[#allocation5 + $0x18] sm:$0xff]  ;;  %vm285_vm1 = vcmask 261120   ;;  %v572_v9 = vld [vmem:[%s1198_s2] ss:$0 sm:$0xff] }
  0x59   : > { %v602_v7 = vpack.c.bf16 %v277_v6, %v276_v4  ;;  %v273_v8 = vld [vmem:[%s232_s13] sm:$0xff]  ;;  %s1068_s15 = sshll.u32 %s931_s22, 7  ;;  %s258_s6 = scalar_lea.vmem [#allocation7], %s1051_s8 }
  0x5a   : > { %600 = vmatpush3.bf16.msra.mxu0 %v599_v5  ;;  %s393_s7 = sshll.u32 %s258_s6, 4  ;;  %s1075_s11 = scalar_lea.hbm %s1199_s3, %s1068_s15  ;;  %s1077_s7 = int_to_ptr.vmem [resolvable:$true] %s393_s7 }
  0x5b   : > { %601 = vmatprep.subr.bf16.mxu0 %v872_v0  ;;  %s875_s14 = smov 96   ;;  %s370_s28 = scalar_lea.sflag [#allocation4], %s1048_s17 }
  0x5c   : > { %s736_s27 = scalar_lea.vmem %s1077_s7, 128  ;;  %s876_s12 = smov [#allocation7]  }
  0x5d   : > { %p737_p4 = scmp.ne.s32.totalorder %s1077_s7, %s736_s27  ;;  %s740_s13 = sshll.u32 %s876_s12, 4  ;;  %s741_s13 = int_to_ptr.vmem [resolvable:$false] %s740_s13 }
  0x5e   : > { %603 = vmatpush3.bf16.msra.mxu0 %v602_v7  ;;  %s742_s24 = scalar_lea.vmem %s741_s13, 256  ;;  %p743_p10 = scmp.lt.s32.totalorder %s1077_s7, %s741_s13 }
  0x5f   : > { %p738_p6 = pnand %p737_p4, %p1003_p12  ;;  %p744_p13 = scmp.lt.s32.totalorder %s742_s24, %s736_s27 }
  0x61   : > { %596 = vmatmul.mubr.msk.f32.vlgmr.msra.gmra.mrb[0].mxu0 %vm285_vm1, %v273_v8  ;;  %p739_p8 = pneg %p738_p6  ;;  %p745_p3 = por %p744_p13, %p743_p10 }
  0x63   : > { %p746_p7 = pnand %p745_p3, %p739_p8 }
 0x134   : > { %v355_v10 = vpop.f32.mrb[0].mxu0 }
 0x135   : > { %v356_v11 = vadd.f32 %v572_v9, %v355_v10  ;;  %v597_v12 = vpop.f32.mrb[1].mxu0 }
 0x137   : > { %361 = vrot.lane.b32.xlu0 %v356_v11, %s875_s14  ;;  %359 = vst.msk [vmem:[%s258_s6] sm:$0xff] %vm285_vm1, %v356_v11 }
 0x138   : > { %749 = shalt.err (!%p746_p7)
}
 0x139   : > { %s750_s17 = scalar_lea.hbm %s1075_s11, 128  ;;  %s754_s16 = scalar_lea.hbm %s1199_s3, 256 }
 0x13a   : > { %p751_p9 = scmp.ne.s32.totalorder %s1075_s11, %s750_s17  ;;  %p755_p0 = scmp.lt.u32.totalorder %s1075_s11, %s1199_s3 }
 0x13b   : > { %p756_p11 = scmp.lt.u32.totalorder %s754_s16, %s750_s17  ;;  %p758_p4 = scmp.lt.u32.totalorder %s750_s17, %s1075_s11 }
 0x13c   : > { %p752_p2 = pnand %p751_p9, %p1003_p12 }
 0x13d   : > { %p757_p1 = por %p756_p11, %p755_p0 }
 0x13e   : > { %p753_p5 = pneg %p752_p2 }
 0x13f   : > { %p759_p6 = por %p758_p4, %p757_p1 }
 0x141   : > { %p760_p8 = pnand %p759_p6, %p753_p5 }
 0x143   : > { %763 = shalt.err (!%p760_p8)
}
 0x144   : > { %610 = dma.vmem_to_hbm [thread:$0]  (%p1003_p12), %s1077_s7, 128, %s1075_s11, %s370_s28  }
 0x145   : > { %s877_s27 = smov 64   ;;  %s374_s12 = sand.u32 1, %s931_s22  }
 0x146   : > { %365 = vrot.lane.b32.xlu0 %v356_v11, %s877_s27  ;;  %s265_s13 = scalar_lea.vmem [#allocation8], %s1051_s8  ;;  %s1108_s6 = scalar_lea.hbm %s1200_s4, %s1068_s15 }
 0x147   : > { %s406_s24 = sshll.u32 %s265_s13, 4  ;;  %s272_s16 = scalar_lea.vmem [#allocation10], %s1051_s8  ;;  %s1110_s24 = int_to_ptr.vmem [resolvable:$true] %s406_s24 }
 0x148   : > { %s1115_s29 = sshll.u32 %s272_s16, 4  ;;  %s1118_s22 = scalar_lea.sflag [#allocation9], %s374_s12  ;;  %s1149_s29 = int_to_ptr.vmem [resolvable:$true] %s1115_s29 }
 0x149   : > { %s764_s7 = scalar_lea.vmem %s1110_s24, 128  ;;  %s878_s11 = smov [#allocation8]  }
 0x14a   : > { %p765_p10 = scmp.ne.s32.totalorder %s1110_s24, %s764_s7  ;;  %s768_s28 = sshll.u32 %s878_s11, 4  ;;  %s769_s28 = int_to_ptr.vmem [resolvable:$false] %s768_s28 }
 0x14b   : > { %s770_s14 = scalar_lea.vmem %s769_s28, 256  ;;  %p771_p7 = scmp.lt.s32.totalorder %s1110_s24, %s769_s28 }
 0x14c   : > { %p766_p13 = pnand %p765_p10, %p1003_p12  ;;  %p772_p9 = scmp.lt.s32.totalorder %s770_s14, %s764_s7 }
 0x14e   : > { %p767_p3 = pneg %p766_p13  ;;  %p773_p2 = por %p772_p9, %p771_p7 }
 0x150   : > { %p774_p5 = pnand %p773_p2, %p767_p3 }
 0x1a9   : > { %v362_v13 = vpop.permute.xlu0 %361 }
 0x1aa   : > { %364 = vst.msk [vmem:[%s265_s13] sm:$0xff] %vm285_vm1, %v362_v13 }
 0x1ab   : > { %777 = shalt.err (!%p774_p5)
}
 0x1ac   : > { %s778_s27 = scalar_lea.hbm %s1108_s6, 128  ;;  %s782_s17 = scalar_lea.hbm %s1200_s4, 256 }
 0x1ad   : > { %p779_p0 = scmp.ne.s32.totalorder %s1108_s6, %s778_s27  ;;  %p783_p4 = scmp.lt.u32.totalorder %s1108_s6, %s1200_s4 }
 0x1ae   : > { %p784_p6 = scmp.lt.u32.totalorder %s782_s17, %s778_s27  ;;  %p786_p10 = scmp.lt.u32.totalorder %s778_s27, %s1108_s6 }
 0x1af   : > { %p780_p11 = pnand %p779_p0, %p1003_p12 }
 0x1b0   : > { %p785_p8 = por %p784_p6, %p783_p4 }
 0x1b1   : > { %p781_p1 = pneg %p780_p11 }
 0x1b2   : > { %p787_p13 = por %p786_p10, %p785_p8 }
 0x1b4   : > { %p788_p3 = pnand %p787_p13, %p781_p1 }
 0x1b6   : > { %791 = shalt.err (!%p788_p3)
}
 0x1b7   : > { %611 = dma.vmem_to_hbm [thread:$0]  (%p1003_p12), %s1110_s24, 128, %s1108_s6, %s1118_s22  }
 0x1b8   : > { %s1146_s14 = scalar_lea.hbm %s1201_s5, %s1068_s15  ;;  %v366_v14 = vpop.permute.xlu0 %365  ;;  %s792_s27 = scalar_lea.vmem %s1149_s29, 128 }
 0x1b9   : > { %368 = vst.msk [vmem:[%s272_s16] sm:$0xff] %vm285_vm1, %v366_v14  ;;  %p793_p7 = scmp.ne.s32.totalorder %s1149_s29, %s792_s27  ;;  %s879_s24 = smov [#allocation10]  }
 0x1ba   : > { %s796_s6 = sshll.u32 %s879_s24, 4  ;;  %s797_s6 = int_to_ptr.vmem [resolvable:$false] %s796_s6 }
 0x1bb   : > { %p794_p9 = pnand %p793_p7, %p1003_p12  ;;  %s798_s12 = scalar_lea.vmem %s797_s6, 256 }
 0x1bc   : > { %p799_p5 = scmp.lt.s32.totalorder %s1149_s29, %s797_s6  ;;  %p800_p0 = scmp.lt.s32.totalorder %s798_s12, %s792_s27 }
 0x1bd   : > { %p795_p2 = pneg %p794_p9 }
 0x1be   : > { %p801_p11 = por %p800_p0, %p799_p5 }
 0x1c0   : > { %p802_p1 = pnand %p801_p11, %p795_p2 }
 0x1c2   : > { %805 = shalt.err (!%p802_p1)
}
 0x1c3   : > { %s806_s8 = scalar_lea.hbm %s1146_s14, 128  ;;  %s810_s13 = scalar_lea.hbm %s1201_s5, 256 }
 0x1c4   : > { %p807_p4 = scmp.ne.s32.totalorder %s1146_s14, %s806_s8  ;;  %p811_p10 = scmp.lt.u32.totalorder %s1146_s14, %s1201_s5 }
 0x1c5   : > { %p812_p13 = scmp.lt.u32.totalorder %s810_s13, %s806_s8  ;;  %p814_p7 = scmp.lt.u32.totalorder %s806_s8, %s1146_s14 }
 0x1c6   : > { %p808_p6 = pnand %p807_p4, %p1003_p12 }
 0x1c7   : > { %p813_p3 = por %p812_p13, %p811_p10 }
 0x1c8   : > { %p809_p8 = pneg %p808_p6 }
 0x1c9   : > { %p815_p9 = por %p814_p7, %p813_p3 }
 0x1cb   : > { %p816_p2 = pnand %p815_p9, %p809_p8 }
 0x1cd   : > { %819 = shalt.err (!%p816_p2)
}
 0x1ce   : > { %612 = dma.vmem_to_hbm [thread:$0]  (%p1003_p12), %s1149_s29, 128, %s1146_s14, %s1118_s22  }
 0x1cf PF: > { %s431_s11 = sand.u32 1, %s854_s18   ;;  %p1216_p5 = scmp.ne.s32.totalorder %s1206_s25, 0 }
 0x1d0   : > { %p1217_p0 = scmp.ge.s32.totalorder %s866_s21, 2  ;;  %s432_s7 = scalar_lea.sflag [#allocation4], %s431_s11 }
 0x1d2   : > { %p625_p11 = pnand %p1217_p0, %p1216_p5 }
 0x1d4   : > { %845 = dma.done.wait (!%p625_p11), %s432_s7, 128  }
 0x1d5   : > { %847 = vsyncadd (!%p625_p11), %s432_s7, 4294967168  ;;  %s440_s28 = sand.u32 1, %s560_s23  }
 0x1d6   : > { %s441_s27 = scalar_lea.sflag [#allocation9], %s440_s28 }
 0x1d7   : > { %849 = dma.done.wait (!%p625_p11), %s441_s27, 256  }
 0x1d8   : > { %851 = vsyncadd (!%p625_p11), %s441_s27, 4294967040  ;;  %p23_p12 = scmp.ge.s32.totalorder %s968_s30, 4   ;;  %s1218_s18 = smov %s858_s19 }
 0x1d9   : > { %s1219_s19 = smov %s862_s20  ;;  %s1220_s20 = smov %s999_s9 }
 0x1da   : > { %s1221_s21 = smov %s968_s30  ;;  %25 = sbr.rel (!%p23_p12) target bundleno = 8 (0x8), region = 113 }
 0x1e1   :  { %455 = vsyncpa [#allocation3], 1 }
 0x1e2   :  { %457 = vsyncpa [#allocation3 + $0x1], 1 }
 0x1e3   :  { %458 = vsyncpa [#allocation6], 1 }
 0x1e4   :  { %459 = vsyncpa [#allocation4], 1 }
 0x1e5   :  { %461 = vsyncpa [#allocation4 + $0x1], 1 }
 0x1e6   :  { %462 = vsyncpa [#allocation9], 1 }
 0x1e7   :  { %464 = vsyncpa [#allocation9 + $0x1], 1 }

</bundles_post_ra>
